<compile_context>
chip_gen: v5e
topology: v5e:2x2
jax: 0.10.0
libtpu: 0.0.40
codegen_flags: <defaults>
</compile_context>

<pallas_src>
import math

import jax
import jax.numpy as jnp
import numpy as np
from jax.experimental import pallas as pl
from jax.experimental.pallas import tpu as pltpu

# Synthetic irreps choice (mul, l, parity) consistent with the module:
IRREPS_IN = [(2, 0, 1), (2, 1, -1)]              # "2x0e + 2x1o"        -> dim 8
IRREPS_OUT = [(4, 0, 1), (3, 1, -1), (2, 1, 1)]  # "4x0e + 3x1o + 2x1e" -> dim 19


def _wigner3j(l1, l2, l3):
    """Real Wigner-3j in the e3nn real (y, z, x) basis, l <= 1, unit Frobenius norm."""
    if (l1, l2, l3) == (0, 0, 0):
        return np.ones((1, 1, 1), np.float32)
    if (l1, l2, l3) == (0, 1, 1):
        return (np.eye(3, dtype=np.float32) / math.sqrt(3.0))[None, :, :]
    if (l1, l2, l3) == (1, 0, 1):
        return (np.eye(3, dtype=np.float32) / math.sqrt(3.0))[:, None, :]
    if (l1, l2, l3) == (1, 1, 0):
        return (np.eye(3, dtype=np.float32) / math.sqrt(3.0))[:, :, None]
    if (l1, l2, l3) == (1, 1, 1):
        eps = np.zeros((3, 3, 3), np.float32)
        for i, j, k in [(0, 1, 2), (1, 2, 0), (2, 0, 1)]:
            eps[i, j, k] = 1.0
            eps[j, i, k] = -1.0
        return eps / math.sqrt(6.0)
    raise NotImplementedError((l1, l2, l3))  # TODO(synk): general-l Wigner 3j not needed for this irreps choice


def build_instructions():
    """Reproduce SelfTp.__init__ path enumeration: (i1, i2>=i1, i_out) with ir3 in ir1*ir2."""
    instr = []
    for i1, (_, l1, p1) in enumerate(IRREPS_IN):
        for i2 in range(i1, len(IRREPS_IN)):
            _, l2, p2 = IRREPS_IN[i2]
            for i_out, (_, l3, p3) in enumerate(IRREPS_OUT):
                if abs(l1 - l2) <= l3 <= l1 + l2 and p3 == p1 * p2:
                    instr.append((i1, i2, i_out))
    return instr


def path_norm_coeffs(instr):
    """e3nn defaults: irrep_normalization='component', path_normalization='element'."""
    coeffs = []
    for (_, _, i_out) in instr:
        l3 = IRREPS_OUT[i_out][1]
        alpha = float(2 * l3 + 1)
        fan = sum(IRREPS_IN[j1][0] * IRREPS_IN[j2][0]
                  for (j1, j2, j_out) in instr if j_out == i_out)
        coeffs.append(math.sqrt(alpha / fan))
    return coeffs


def build_bilinear(weights1, weights2, instr):
    """Fold SelfTp's weight outer products + Wigner 3j into B[p, q, o] (asymmetric, i2>=i1 blocks only)."""
    dims_in = [m * (2 * l + 1) for m, l, _ in IRREPS_IN]
    dims_out = [m * (2 * l + 1) for m, l, _ in IRREPS_OUT]
    in_off = np.cumsum([0] + dims_in)
    out_off = np.cumsum([0] + dims_out)
    coeffs = path_norm_coeffs(instr)

    B = jnp.zeros((int(in_off[-1]), int(in_off[-1]), int(out_off[-1])), jnp.float32)
    for (i1, i2, i_out), w1, w2, c in zip(instr, weights1, weights2, coeffs):
        mul1, l1, _ = IRREPS_IN[i1]
        mul2, l2, _ = IRREPS_IN[i2]
        mul3, l3, _ = IRREPS_OUT[i_out]
        d1, d2, d3 = 2 * l1 + 1, 2 * l2 + 1, 2 * l3 + 1
        # SelfTp.forward: weight = w1[:, None, :] * w2[None, :, :]  -> (mul1, mul2, mul3)
        W = w1[:, None, :] * w2[None, :, :]
        C = jnp.asarray(_wigner3j(l1, l2, l3))
        blk = c * jnp.einsum('uvw,ijk->uivjwk', W, C)
        blk = blk.reshape(mul1 * d1, mul2 * d2, mul3 * d3)
        B = B.at[int(in_off[i1]):int(in_off[i1 + 1]),
                 int(in_off[i2]):int(in_off[i2 + 1]),
                 int(out_off[i_out]):int(out_off[i_out + 1])].add(blk)
    return B


# ----------------------------- Pallas kernel --------------------------------

def _selftp_kernel(xt_ref, bt_ref, ot_ref):
    # Transposed layout: batch is the lane (last) axis everywhere.
    #   xt_ref: (P, TN)       x^T tile
    #   bt_ref: (O, P*P)      B[p, q, o] flattened over (p, q), then transposed
    #   ot_ref: (O, TN)       out^T tile  (lane-dense: TN is a multiple of 128)
    P = xt_ref.shape[0]
    x = xt_ref[...]                                        # (P, TN)
    # Quadratic features stacked along the SUBLANE axis:
    #   xx[p*P + q, :] = x[p, :] * x[q, :]
    # x[p:p+1, :] is a single-sublane row broadcast over sublanes (cheap VPU
    # work, full 128-lane utilization); stacking (8, TN) slabs along axis 0 is
    # free vreg placement (each slab is exactly one sublane tile tall).
    slabs = [x * x[p:p + 1, :] for p in range(P)]          # P slabs of (P, TN)
    xx = jnp.concatenate(slabs, axis=0)                    # (P*P, TN)
    # Single MXU matmul per tile, lane-dense result: (O, P*P) @ (P*P, TN).
    ot_ref[...] = jnp.dot(bt_ref[...], xx,
                          preferred_element_type=jnp.float32).astype(ot_ref.dtype)


def _num_tensorcores():
    """Best-effort: v7x has 2 TensorCores per chip; v5e/v6e have 1."""
    try:
        kind = jax.devices()[0].device_kind.lower()
    except Exception:
        return 1
    return 2 if "v7" in kind else 1


def selftp_forward(x, B_flat_t, *, block_n=None):
    """x: (N, P) node features; B_flat_t: (O, P*P) folded bilinear weights."""
    N, P = x.shape
    O, PP = B_flat_t.shape
    assert PP == P * P

    # Transpose in the wrapper so the batch dim rides on the lane axis inside
    # the kernel.  (Production callers can keep their data transposed and skip
    # these two XLA transposes entirely.)
    xt = x.T                                               # (P, N)

    if block_n is None:
        # Per-tile VMEM (x^T + xx + out^T + B) is KBs even double-buffered, so
        # tile size is chosen purely to amortize the ~0.35 us/grid-step
        # overhead and, on v7x only, to give both TensorCores work.
        cap = 2048
        if _num_tensorcores() >= 2 and N > 128:
            # >= 2 balanced, 128-aligned tiles for the "parallel" grid axis.
            half = pl.cdiv(N, 2)
            block_n = min(cap, pl.cdiv(half, 128) * 128)
        elif N <= cap:
            block_n = N          # single step; block == full array (layout rule ok)
        else:
            block_n = cap        # multiple of 128

    grid = (pl.cdiv(N, block_n),)
    out_t = pl.pallas_call(
        _selftp_kernel,
        out_shape=jax.ShapeDtypeStruct((O, N), x.dtype),
        grid=grid,
        in_specs=[
            pl.BlockSpec((P, block_n), lambda i: (0, i)),
            # Constant index_map: the tiny (O, P*P) weight tile stays resident.
            pl.BlockSpec((O, PP), lambda i: (0, 0)),
        ],
        out_specs=pl.BlockSpec((O, block_n), lambda i: (0, i)),
        compiler_params=pltpu.CompilerParams(dimension_semantics=("parallel",)),
    )(xt, B_flat_t)
    return out_t.T                                         # (N, O)


# --------------------------------- main --------------------------------------

if __name__ == "__main__":
    key = jax.random.PRNGKey(0)
    instr = build_instructions()
    keys = jax.random.split(key, 2 * len(instr) + 2)

    # Deterministic stand-in for nn.Parameter(torch.randn(mul, mul_out)) lists.
    weights1, weights2 = [], []
    for n, (i1, i2, i_out) in enumerate(instr):
        mul1 = IRREPS_IN[i1][0]
        mul2 = IRREPS_IN[i2][0]
        mul3 = IRREPS_OUT[i_out][0]
        weights1.append(jax.random.normal(keys[2 * n], (mul1, mul3), jnp.float32))
        weights2.append(jax.random.normal(keys[2 * n + 1], (mul2, mul3), jnp.float32))

    B = build_bilinear(weights1, weights2, instr)          # (P, P, O), asymmetric
    P = B.shape[0]
    O = B.shape[-1]
    # Flatten over (p, q) and transpose so the kernel's weight tile is (O, P*P).
    B_flat_t = B.reshape(P * P, O).T                       # (O, P*P)

    # Main check: batch of nodes/edges (multiple of 128 for the lane-dense path).
    N = 256
    x = jax.random.normal(keys[-2], (N, P), jnp.float32)
    out = jax.block_until_ready(selftp_forward(x, B_flat_t))
    ref = jnp.einsum('pqo,np,nq->no', B, x, x)
    np.testing.assert_allclose(np.asarray(out), np.asarray(ref), rtol=1e-4, atol=1e-4)

    # Secondary check: N not a multiple of 128 (single full-array block).
    N2 = 100
    x2 = jax.random.normal(keys[-1], (N2, P), jnp.float32)
    out2 = jax.block_until_ready(selftp_forward(x2, B_flat_t))
    ref2 = jnp.einsum('pqo,np,nq->no', B, x2, x2)
    np.testing.assert_allclose(np.asarray(out2), np.asarray(ref2), rtol=1e-4, atol=1e-4)

    print("KERNEL_OK")
</pallas_src>

<mosaic_0001>
module attributes {stable_mosaic.version = 11 : i64} {
  func.func @_selftp_kernel(%arg0: i32, %arg1: memref<8x256xf32, #tpu.memory_space<vmem>>, %arg2: memref<19x64xf32, #tpu.memory_space<vmem>>, %arg3: memref<19x256xf32, #tpu.memory_space<vmem>>) attributes {dimension_semantics = [#tpu.dimension_semantics<parallel>], iteration_bounds = array<i64: 1>, scalar_prefetch = 0 : i64, scratch_operands = 0 : i64, tpu.core_type = #tpu.core_type<tc>, window_params = [{transform_indices = @transform_0, window_bounds = array<i64: 8, 256>}, {pipeline_mode = #tpu.pipeline_mode<synchronous>, transform_indices = @transform_1, window_bounds = array<i64: 19, 64>}, {transform_indices = @transform_2, window_bounds = array<i64: 19, 256>}]} {
    %c0 = arith.constant 0 : index
    %c0_0 = arith.constant 0 : index
    %0 = vector.load %arg1[%c0, %c0_0] : memref<8x256xf32, #tpu.memory_space<vmem>>, vector<8x256xf32>
    %1 = vector.extract_strided_slice %0 {offsets = [0, 0], sizes = [1, 256], strides = [1, 1]} : vector<8x256xf32> to vector<1x256xf32>
    %2 = vector.broadcast %1 : vector<1x256xf32> to vector<8x256xf32>
    %3 = arith.mulf %0, %2 : vector<8x256xf32>
    %4 = vector.extract_strided_slice %0 {offsets = [1, 0], sizes = [1, 256], strides = [1, 1]} : vector<8x256xf32> to vector<1x256xf32>
    %5 = vector.broadcast %4 : vector<1x256xf32> to vector<8x256xf32>
    %6 = arith.mulf %0, %5 : vector<8x256xf32>
    %7 = vector.extract_strided_slice %0 {offsets = [2, 0], sizes = [1, 256], strides = [1, 1]} : vector<8x256xf32> to vector<1x256xf32>
    %8 = vector.broadcast %7 : vector<1x256xf32> to vector<8x256xf32>
    %9 = arith.mulf %0, %8 : vector<8x256xf32>
    %10 = vector.extract_strided_slice %0 {offsets = [3, 0], sizes = [1, 256], strides = [1, 1]} : vector<8x256xf32> to vector<1x256xf32>
    %11 = vector.broadcast %10 : vector<1x256xf32> to vector<8x256xf32>
    %12 = arith.mulf %0, %11 : vector<8x256xf32>
    %13 = vector.extract_strided_slice %0 {offsets = [4, 0], sizes = [1, 256], strides = [1, 1]} : vector<8x256xf32> to vector<1x256xf32>
    %14 = vector.broadcast %13 : vector<1x256xf32> to vector<8x256xf32>
    %15 = arith.mulf %0, %14 : vector<8x256xf32>
    %16 = vector.extract_strided_slice %0 {offsets = [5, 0], sizes = [1, 256], strides = [1, 1]} : vector<8x256xf32> to vector<1x256xf32>
    %17 = vector.broadcast %16 : vector<1x256xf32> to vector<8x256xf32>
    %18 = arith.mulf %0, %17 : vector<8x256xf32>
    %19 = vector.extract_strided_slice %0 {offsets = [6, 0], sizes = [1, 256], strides = [1, 1]} : vector<8x256xf32> to vector<1x256xf32>
    %20 = vector.broadcast %19 : vector<1x256xf32> to vector<8x256xf32>
    %21 = arith.mulf %0, %20 : vector<8x256xf32>
    %22 = vector.extract_strided_slice %0 {offsets = [7, 0], sizes = [1, 256], strides = [1, 1]} : vector<8x256xf32> to vector<1x256xf32>
    %23 = vector.broadcast %22 : vector<1x256xf32> to vector<8x256xf32>
    %24 = arith.mulf %0, %23 : vector<8x256xf32>
    %25 = tpu.concatenate %3, %6, %9, %12, %15, %18, %21, %24 in 0 : vector<8x256xf32>, vector<8x256xf32>, vector<8x256xf32>, vector<8x256xf32>, vector<8x256xf32>, vector<8x256xf32>, vector<8x256xf32>, vector<8x256xf32> -> vector<64x256xf32>
    %c0_1 = arith.constant 0 : index
    %c0_2 = arith.constant 0 : index
    %26 = vector.load %arg2[%c0_1, %c0_2] : memref<19x64xf32, #tpu.memory_space<vmem>>, vector<19x64xf32>
    %cst = arith.constant dense<0.000000e+00> : vector<19x256xf32>
    %27 = tpu.matmul %26, %25, %cst {dimension_numbers = #tpu.dot_dimension_numbers<[1], [0], [0], [1], [0, 0, 1, 1], [], []>} : vector<19x64xf32>, vector<64x256xf32>, vector<19x256xf32> -> vector<19x256xf32>
    %c0_3 = arith.constant 0 : index
    %c0_4 = arith.constant 0 : index
    %28 = vector.load %arg3[%c0_3, %c0_4] : memref<19x256xf32, #tpu.memory_space<vmem>>, vector<19x256xf32>
    tpu.vector_store %arg3[%c0_3, %c0_4], %27 {strides = array<i32>} : memref<19x256xf32, #tpu.memory_space<vmem>>, vector<19x256xf32>,
    return
  }
  func.func @transform_0(%arg0: i32) -> (i32, i32) {
    %c0_i32 = arith.constant 0 : i32
    %c0_i32_0 = arith.constant 0 : i32
    return %c0_i32, %arg0 : i32, i32
  }
  func.func @transform_1(%arg0: i32) -> (i32, i32) {
    %c0_i32 = arith.constant 0 : i32
    %c0_i32_0 = arith.constant 0 : i32
    %c0_i32_1 = arith.constant 0 : i32
    return %c0_i32, %c0_i32_0 : i32, i32
  }
  func.func @transform_2(%arg0: i32) -> (i32, i32) {
    %c0_i32 = arith.constant 0 : i32
    %c0_i32_0 = arith.constant 0 : i32
    return %c0_i32, %arg0 : i32, i32
  }
}

</mosaic_0001>

<bundles_post_ra>
// kernel: tpu_custom_call.1
= control target key start
LH: loop header
LB: loop body
LE: loop exit
PB: predicated region body
PF: predicated region fallthrough
CT: control target
= control target key end

     0   :  { %7 = vsyncpa [#allocation3], 0  ;;  %s305_s0 = inlined_call_operand.hbm [shape: f32[8,256], index: 0, kind: input, shape index: {}]   ;;  %s306_s1 = inlined_call_operand.hbm [shape: f32[19,64], index: 1, kind: input, shape index: {}]   ;;  %s307_s2 = inlined_call_operand.hbm [shape: f32[19,256], index: 2, kind: output, shape index: {}]  }
   0x1   :  { %8 = vsyncpa [#allocation6], 0 }
   0x2   :  { %9 = vsyncpa [#allocation4], 0  ;;  %s15_s11 = sshll.u32 %s305_s0, 4  ;;  %s274_s12 = smov [#allocation2]   ;;  %s16_s11 = int_to_ptr.hbm [resolvable:$true] %s15_s11 }
   0x3   :  { %s17_s13 = sshll.u32 %s274_s12, 4  ;;  %s25_s16 = sshll.u32 %s306_s1, 4  ;;  %s18_s13 = int_to_ptr.vmem [resolvable:$true] %s17_s13  ;;  %s26_s16 = int_to_ptr.hbm [resolvable:$true] %s25_s16 }
   0x4   :  { %20 = dma.hbm_to_vmem [thread:$0]  %s16_s11, 256, %s18_s13, [#allocation3]  }
   0x5   :  { %s275_s17 = smov [#allocation5]   ;;  %s276_s19 = smov 128  }
   0x6   :  { %s27_s18 = sshll.u32 %s275_s17, 4  ;;  %s277_s20 = smov 8   ;;  %s28_s18 = int_to_ptr.vmem [resolvable:$true] %s27_s18 }
   0x7   :  { %33 = dma.hbm_to_vmem [thread:$0]  %s26_s16, 384, %s28_s18, [#allocation6], %s276_s19, %s276_s19, %s277_s20  }
   0x8   :  { %268 = dma.done.wait [#allocation3], 256  }
   0x9   :  { %269 = vsyncadd [#allocation3], 4294967040 }
   0xa   :  { %270 = dma.done.wait [#allocation6], 384  }
   0xb   :  { %271 = vsyncadd [#allocation6], 4294966912  ;;  %v42_v0 = vld [vmem:[#allocation2] sm:$0xff]  ;;  %v43_v1 = vld [vmem:[#allocation2 + $0x8] sm:$0xff]  ;;  %vm79_vm0 = vcmask 523264   ;;  %s278_s0 = smov [#allocation7]  }
   0xc   :  { %v72_v2 = vperm.slane %v42_v0, 7  ;;  %v73_v3 = vperm.slane %v43_v1, 7  ;;  %v68_v4 = vperm.slane %v42_v0, 6  ;;  %v69_v5 = vperm.slane %v43_v1, 6  ;;  %v77_v34 = vld [vmem:[#allocation5 + $0x8] sm:$0xff]  ;;  %v76_v35 = vld [vmem:[#allocation5] sm:$0xff] }
   0xd   :  { %v64_v6 = vperm.slane %v42_v0, 5  ;;  %v65_v7 = vperm.slane %v43_v1, 5  ;;  %v60_v8 = vperm.slane %v42_v0, 4  ;;  %v61_v9 = vperm.slane %v43_v1, 4  ;;  %v78_v36 = vld [vmem:[#allocation5 + $0x10] sm:$0x7] }
   0xe   :  { %v74_v10 = vmul.f32 %v72_v2, %v42_v0  ;;  %v75_v11 = vmul.f32 %v73_v3, %v43_v1  ;;  %v70_v12 = vmul.f32 %v68_v4, %v42_v0  ;;  %v71_v13 = vmul.f32 %v69_v5, %v43_v1  ;;  %s151_s1 = sshll.u32 %s278_s0, 4  ;;  %s153_s23 = sshll.u32 %s307_s2, 4  ;;  %s152_s1 = int_to_ptr.vmem [resolvable:$true] %s151_s1  ;;  %s154_s23 = int_to_ptr.hbm [resolvable:$true] %s153_s23 }
   0xf   :  { %v66_v14 = vmul.f32 %v64_v6, %v42_v0  ;;  %v67_v15 = vmul.f32 %v65_v7, %v43_v1  ;;  %v56_v16 = vperm.slane %v42_v0, 3  ;;  %v57_v17 = vperm.slane %v43_v1, 3  ;;  %s279_s24 = smov 256   ;;  %s280_s25 = smov 16  }
  0x10   :  { %173 = vmatpush.msra.mxu2 %v74_v10  ;;  %181 = vmatpush.msra.mxu3 %v75_v11  ;;  %v62_v18 = vmul.f32 %v60_v8, %v42_v0  ;;  %v63_v19 = vmul.f32 %v61_v9, %v43_v1  ;;  %v52_v20 = vperm.slane %v42_v0, 2  ;;  %v53_v21 = vperm.slane %v43_v1, 2 }
  0x11   :  { %97 = vmatpush.msra.mxu0 %v74_v10  ;;  %123 = vmatpush.msra.mxu1 %v75_v11  ;;  %v58_v22 = vmul.f32 %v56_v16, %v42_v0  ;;  %v59_v23 = vmul.f32 %v57_v17, %v43_v1  ;;  %v48_v24 = vperm.slane %v42_v0, 1  ;;  %v49_v25 = vperm.slane %v43_v1, 1 }
  0x12   :  { %174 = vmatpush.msra.mxu2 %v70_v12  ;;  %182 = vmatpush.msra.mxu3 %v71_v13  ;;  %v54_v26 = vmul.f32 %v52_v20, %v42_v0  ;;  %v55_v27 = vmul.f32 %v53_v21, %v43_v1  ;;  %v44_v28 = vperm.slane %v42_v0, 0  ;;  %v45_v29 = vperm.slane %v43_v1, 0 }
  0x13   :  { %98 = vmatpush.msra.mxu0 %v70_v12  ;;  %124 = vmatpush.msra.mxu1 %v71_v13  ;;  %v50_v30 = vmul.f32 %v48_v24, %v42_v0  ;;  %v51_v31 = vmul.f32 %v49_v25, %v43_v1 }
  0x14   :  { %175 = vmatpush.msra.mxu2 %v66_v14  ;;  %183 = vmatpush.msra.mxu3 %v67_v15  ;;  %v46_v32 = vmul.f32 %v44_v28, %v42_v0  ;;  %v47_v33 = vmul.f32 %v45_v29, %v43_v1 }
  0x15   :  { %99 = vmatpush.msra.mxu0 %v66_v14  ;;  %125 = vmatpush.msra.mxu1 %v67_v15 }
  0x16   :  { %176 = vmatpush.msra.mxu2 %v62_v18  ;;  %184 = vmatpush.msra.mxu3 %v63_v19 }
  0x17   :  { %100 = vmatpush.msra.mxu0 %v62_v18  ;;  %126 = vmatpush.msra.mxu1 %v63_v19 }
  0x18   :  { %177 = vmatpush.msra.mxu2 %v58_v22  ;;  %185 = vmatpush.msra.mxu3 %v59_v23 }
  0x19   :  { %101 = vmatpush.msra.mxu0 %v58_v22  ;;  %127 = vmatpush.msra.mxu1 %v59_v23 }
  0x1a   :  { %178 = vmatpush.msra.mxu2 %v54_v26  ;;  %186 = vmatpush.msra.mxu3 %v55_v27 }
  0x1b   :  { %102 = vmatpush.msra.mxu0 %v54_v26  ;;  %128 = vmatpush.msra.mxu1 %v55_v27 }
  0x1c   :  { %179 = vmatpush.msra.mxu2 %v50_v30  ;;  %187 = vmatpush.msra.mxu3 %v51_v31 }
  0x1d   :  { %103 = vmatpush.msra.mxu0 %v50_v30  ;;  %129 = vmatpush.msra.mxu1 %v51_v31 }
  0x1e   :  { %180 = vmatpush.msra.mxu2 %v46_v32  ;;  %188 = vmatpush.msra.mxu3 %v47_v33 }
  0x1f   :  { %168 = vmatmul.msk.f32.vlgmr.msra.gmra.mxu2 %vm79_vm0, %v77_v34  ;;  %171 = vmatmul.msk.f32.vlgmr.msra.gmra.mxu3 %vm79_vm0, %v77_v34 }
  0x20   :  { %104 = vmatpush.msra.mxu0 %v46_v32  ;;  %130 = vmatpush.msra.mxu1 %v47_v33 }
  0x21   :  { %167 = vmatmul.msk.f32.vlgmr.msra.gmra.mxu0 %vm79_vm0, %v76_v35  ;;  %170 = vmatmul.msk.f32.vlgmr.msra.gmra.mxu1 %vm79_vm0, %v76_v35 }
  0x27   :  { %169 = vmatmul.msk.f32.gmra.mxu2 %vm79_vm0, %v78_v36  ;;  %172 = vmatmul.msk.f32.gmra.mxu3 %vm79_vm0, %v78_v36 }
  0x9e   :  { %v106_v37 = vpop.f32.mrf.mxu0  ;;  %v132_v38 = vpop.f32.mrf.mxu1 }
  0x9f   :  { %141 = vst [vmem:[#allocation7] sm:$0xff] %v106_v37 }
  0xa0   :  { %142 = vst [vmem:[#allocation7 + $0x8] sm:$0xff] %v132_v38 }
  0xa2   :  { %v109_v39 = vpop.f32.mrf.mxu2  ;;  %v135_v40 = vpop.f32.mrf.mxu3 }
  0xa3   :  { %143 = vst [vmem:[#allocation7 + $0x10] sm:$0xff] %v109_v39 }
  0xa4   :  { %144 = vst [vmem:[#allocation7 + $0x18] sm:$0xff] %v135_v40 }
  0xaa   :  { %v112_v41 = vpop.f32.mrf.mxu2  ;;  %v138_v42 = vpop.f32.mrf.mxu3 }
  0xab   :  { %145 = vst [vmem:[#allocation7 + $0x20] sm:$0x7] %v112_v41 }
  0xac   :  { %146 = vst [vmem:[#allocation7 + $0x28] sm:$0x7] %v138_v42 }
  0xad   :  { %159 = dma.vmem_to_hbm [thread:$0]  %s152_s1, 768, %s154_s23, [#allocation4], %s279_s24, %s279_s24, %s280_s25  }
  0xae   :  { %272 = dma.done.wait [#allocation4], 768  }
  0xaf   :  { %273 = vsyncadd [#allocation4], 4294966528 }
  0xb0   :  { %164 = vsyncpa [#allocation3], 1 }
  0xb1   :  { %165 = vsyncpa [#allocation6], 1 }
  0xb2   :  { %166 = vsyncpa [#allocation4], 1 }

</bundles_post_ra>
